<compile_context>
chip_gen: v5e
topology: v5e:2x2
jax: 0.10.0
libtpu: 0.0.40
codegen_flags: <defaults>
</compile_context>

<pallas_src>
import functools
import math

import jax
import jax.numpy as jnp
from jax.experimental import pallas as pl
from jax.experimental.pallas import tpu as pltpu

_VMEM_LIMIT = 64 * 1024 * 1024  # <= v7x physical VMEM; ample headroom on v5e/v6e (128 MiB)


# ---------------------------------------------------------------------------
# Tiling helpers
# ---------------------------------------------------------------------------
def _round_up(x, m):
    return (x + m - 1) // m * m


def _row_tile(m, max_rows=1024):
    """Fixed row tile used with a pl.cdiv grid (ragged last block is handled by Pallas).

    Never collapses to a tiny 8-row tile for awkward M and never returns one huge full-M
    tile for large M; tries to produce >=2 row blocks so both v7x TensorCores get work
    along the 'parallel' row axis.
    """
    if m <= 8:
        return m
    if m <= 2 * max_rows:
        return int(min(_round_up(pl.cdiv(m, 2), 8), max_rows))
    return max_rows


def _col_tile(n, k, itemsize, max_weight_bytes=8 * 1024 * 1024):
    """Tile the weight's N dim so one (K, tn) weight block stays under max_weight_bytes
    (keeps the double-buffered weight inside v7x's 64 MiB VMEM). Multiples of 256 to keep
    the 2x256x256 MXU fully fed on v6e/v7x."""
    if k * n * itemsize <= max_weight_bytes:
        return n
    tn = (max_weight_bytes // (k * itemsize)) // 256 * 256
    return int(min(max(256, tn), n))


def _ln_f32(x, g, b, eps):
    """Row-wise LayerNorm in f32 (x: (rows, H), g/b: (1, H))."""
    mu = jnp.mean(x, axis=-1, keepdims=True)
    xc = x - mu
    var = jnp.mean(xc * xc, axis=-1, keepdims=True)
    return xc * jax.lax.rsqrt(var + eps) * g + b


# ---------------------------------------------------------------------------
# Fused linear kernel:  [LN_in ->] matmul + bias [-> relu] [+ (LN_res?) residual] [-> LN_out]
# ---------------------------------------------------------------------------
def _make_linear_kernel(*, has_ln_in, activation, has_res, has_ln_res, has_ln_out, eps):
    def kernel(*refs):
        it = iter(refs)
        x_ref = next(it)
        gi_ref = bi_ref = None
        if has_ln_in:
            gi_ref, bi_ref = next(it), next(it)
        w_ref, b_ref = next(it), next(it)
        r_ref = gr_ref = br_ref = None
        if has_res:
            r_ref = next(it)
            if has_ln_res:
                gr_ref, br_ref = next(it), next(it)
        go_ref = bo_ref = None
        if has_ln_out:
            go_ref, bo_ref = next(it), next(it)
        o_ref = next(it)

        x = x_ref[...]
        if has_ln_in:
            x = _ln_f32(x.astype(jnp.float32), gi_ref[...].astype(jnp.float32),
                        bi_ref[...].astype(jnp.float32), eps)
        # MXU operands stay in the weight dtype (bf16 on bf16 models); accumulate in f32.
        y = jnp.dot(x.astype(w_ref.dtype), w_ref[...],
                    preferred_element_type=jnp.float32)
        y = y + b_ref[...].astype(jnp.float32)
        if activation == "relu":
            y = jnp.maximum(y, 0.0)
        if has_res:
            r = r_ref[...].astype(jnp.float32)
            if has_ln_res:
                r = _ln_f32(r, gr_ref[...].astype(jnp.float32),
                            br_ref[...].astype(jnp.float32), eps)
            y = y + r
        if has_ln_out:
            y = _ln_f32(y, go_ref[...].astype(jnp.float32),
                        bo_ref[...].astype(jnp.float32), eps)
        o_ref[...] = y.astype(o_ref.dtype)

    return kernel


def fused_linear(x, w, b, *, ln_in=None, activation=None, residual=None,
                 ln_residual=None, ln_out=None, out_dtype=None, eps=1e-5,
                 max_rows=1024):
    """y = [LN_out]( [relu]( [LN_in](x) @ w + b ) + [LN_res](residual) )  on the MXU.

    x: (M, K); w: (K, N); b: (N,); residual: (M, N); ln_*: (gamma, beta) tuples."""
    M, K = x.shape
    N = w.shape[1]
    out_dtype = out_dtype or x.dtype
    tm = _row_tile(M, max_rows)
    # LN over the output / residual needs the full row -> no N tiling in that case.
    if ln_out is not None or ln_residual is not None:
        tn = N
    else:
        tn = _col_tile(N, K, jnp.dtype(w.dtype).itemsize)
    gm, gn = pl.cdiv(M, tm), pl.cdiv(N, tn)
    # N blocks slow, row blocks fast: the (K, tn) weight block stays resident across
    # consecutive row steps (no weight re-DMA per row tile).
    grid = (gn, gm)

    def vec(v):
        return v.reshape(1, -1)

    in_specs = [pl.BlockSpec((tm, K), lambda jn, im: (im, 0))]
    inputs = [x]
    if ln_in is not None:
        g, bb = ln_in
        in_specs += [pl.BlockSpec((1, K), lambda jn, im: (0, 0)),
                     pl.BlockSpec((1, K), lambda jn, im: (0, 0))]
        inputs += [vec(g), vec(bb)]
    in_specs += [pl.BlockSpec((K, tn), lambda jn, im: (0, jn)),
                 pl.BlockSpec((1, tn), lambda jn, im: (0, jn))]
    inputs += [w, vec(b)]
    if residual is not None:
        in_specs.append(pl.BlockSpec((tm, tn), lambda jn, im: (im, jn)))
        inputs.append(residual)
        if ln_residual is not None:
            g, bb = ln_residual
            in_specs += [pl.BlockSpec((1, tn), lambda jn, im: (0, 0)),
                         pl.BlockSpec((1, tn), lambda jn, im: (0, 0))]
            inputs += [vec(g), vec(bb)]
    if ln_out is not None:
        g, bb = ln_out
        in_specs += [pl.BlockSpec((1, tn), lambda jn, im: (0, 0)),
                     pl.BlockSpec((1, tn), lambda jn, im: (0, 0))]
        inputs += [vec(g), vec(bb)]

    kernel = _make_linear_kernel(
        has_ln_in=ln_in is not None, activation=activation,
        has_res=residual is not None, has_ln_res=ln_residual is not None,
        has_ln_out=ln_out is not None, eps=eps)

    return pl.pallas_call(
        kernel,
        out_shape=jax.ShapeDtypeStruct((M, N), out_dtype),
        grid=grid,
        in_specs=in_specs,
        out_specs=pl.BlockSpec((tm, tn), lambda jn, im: (im, jn)),
        compiler_params=pltpu.CompilerParams(
            dimension_semantics=("parallel", "parallel"),
            vmem_limit_bytes=_VMEM_LIMIT),
    )(*inputs)


# ---------------------------------------------------------------------------
# Fused attention kernel: all heads per batch, softmax, ctx@Wo + bias + residual
# ---------------------------------------------------------------------------
def _make_attention_kernel(*, n_head, d_head, scale_inv, has_mask):
    def kernel(*refs):
        if has_mask:
            qkv_ref, mask_ref, wo_ref, bo_ref, res_ref, o_ref, p_ref = refs
        else:
            qkv_ref, wo_ref, bo_ref, res_ref, o_ref, p_ref = refs
            mask_ref = None

        dq = n_head * d_head
        qkv = qkv_ref[...]                              # (S, 3*dq), model dtype
        mask = mask_ref[...].astype(jnp.float32) if mask_ref is not None else None
        wo = wo_ref[...]                                # (dq, H)
        # Start the output accumulator from residual + bias (fused residual add).
        out = res_ref[...].astype(jnp.float32) + bo_ref[...].astype(jnp.float32)

        for h in range(n_head):                         # static unroll over heads
            lo = h * d_head
            q = qkv[:, lo:lo + d_head]
            k = qkv[:, dq + lo:dq + lo + d_head]
            v = qkv[:, 2 * dq + lo:2 * dq + lo + d_head]
            # Fold 1/sqrt(d_head) into q: O(S*d) instead of O(S^2) per head.
            q = q * scale_inv
            s = jax.lax.dot_general(q, k, (((1,), (1,)), ((), ())),
                                    preferred_element_type=jnp.float32)
            if mask is not None:
                s = s + mask
            s_max = jnp.max(s, axis=-1, keepdims=True)
            e = jnp.exp(s - s_max)
            denom = jnp.sum(e, axis=-1, keepdims=True)
            p = e * pl.reciprocal(denom, approx=True)   # EUP slot, ~free next to VPU work
            p_ref[h, :, :] = p.astype(p_ref.dtype)
            # Flash-style fusion with the output projection: ctx_h @ Wo_h accumulated
            # straight into bias+residual; MXU operands stay in the model dtype.
            ctx_h = jnp.dot(p.astype(qkv.dtype), v,
                            preferred_element_type=jnp.float32)
            out = out + jnp.dot(ctx_h.astype(wo.dtype), wo[lo:lo + d_head, :],
                                preferred_element_type=jnp.float32)

        o_ref[...] = out.astype(o_ref.dtype)

    return kernel


def attention_block(qkv, mask, wo, bo, residual, *, n_head, d_head):
    """qkv: (B, S, 3*n_head*d_head) fused projections; mask: (B, 1, S, S) additive or None;
    wo: (n_head*d_head, H); bo: (H,); residual: (B, S, H).
    Returns (attn_out = softmax(qk^T/scale + mask) v @ wo + bo + residual, probs)."""
    # TODO(synk): single-block over S per batch; a flash-style KV-tiled variant would be
    # needed for very long sequences.
    B, S, dq3 = qkv.shape
    dq = dq3 // 3
    H = wo.shape[1]
    has_mask = mask is not None

    kernel = _make_attention_kernel(n_head=n_head, d_head=d_head,
                                    scale_inv=1.0 / math.sqrt(d_head),
                                    has_mask=has_mask)

    in_specs = [pl.BlockSpec((pl.Squeezed(), S, dq3), lambda b: (b, 0, 0))]
    inputs = [qkv]
    if has_mask:
        in_specs.append(pl.BlockSpec((pl.Squeezed(), S, S), lambda b: (b, 0, 0)))
        inputs.append(mask.reshape(B, S, S))
    in_specs += [pl.BlockSpec((dq, H), lambda b: (0, 0)),
                 pl.BlockSpec((1, H), lambda b: (0, 0)),
                 pl.BlockSpec((pl.Squeezed(), S, H), lambda b: (b, 0, 0))]
    inputs += [wo, bo.reshape(1, H), residual]

    out_shapes = (jax.ShapeDtypeStruct((B, S, H), residual.dtype),
                  jax.ShapeDtypeStruct((B, n_head, S, S), qkv.dtype))
    out_specs = (pl.BlockSpec((pl.Squeezed(), S, H), lambda b: (b, 0, 0)),
                 pl.BlockSpec((pl.Squeezed(), n_head, S, S), lambda b: (b, 0, 0, 0)))

    return pl.pallas_call(
        kernel,
        out_shape=out_shapes,
        grid=(B,),
        in_specs=in_specs,
        out_specs=out_specs,
        compiler_params=pltpu.CompilerParams(
            dimension_semantics=("parallel",),
            vmem_limit_bytes=_VMEM_LIMIT),
    )(*inputs)


# ---------------------------------------------------------------------------
# Module forward (layout glue is metadata-only reshapes; compute is 4 pallas_calls)
# ---------------------------------------------------------------------------
def transformer_encoder_layer(x, mask, params, *, n_head, d_head, pre_ln, eps=1e-5):
    """x: (B, S, hidden); mask: (B, 1, S, S) additive or None. Returns (out, attn_probs)."""
    # TODO(synk): dropattn / droplayer / ffn_dropout are identity (inference / p=0).
    B, S, H = x.shape
    M = B * S
    x2 = x.reshape(M, H)
    p = params["mha"]
    f = params["ffn"]

    # Fused QKV projection weights (in production this concat is done once at load time).
    wqkv = jnp.concatenate([p["wq"], p["wk"], p["wv"]], axis=1)
    bqkv = jnp.concatenate([p["bq"], p["bk"], p["bv"]], axis=0)

    ln1 = (params["ln1_g"], params["ln1_b"])
    ln2 = (params["ln2_g"], params["ln2_b"])

    if pre_ln:
        # qkv = LN1(x) @ Wqkv + bqkv            (LayerNorm fused into the QKV matmul)
        qkv = fused_linear(x2, wqkv, bqkv, ln_in=ln1, eps=eps)
        # attn = softmax(...)V @ Wo + bo + x    (attention + out-proj + residual fused)
        attn3, probs = attention_block(qkv.reshape(B, S, -1), mask, p["wo"], p["bo"],
                                       x, n_head=n_head, d_head=d_head)
        attn2 = attn3.reshape(M, H)
        # h = relu(LN2(attn) @ W1 + b1)         (LayerNorm fused into FFN1)
        h = fused_linear(attn2, f["w1"], f["b1"], ln_in=ln2, activation="relu", eps=eps)
        # out = h @ W2 + b2 + attn              (residual fused into FFN2)
        out2 = fused_linear(h, f["w2"], f["b2"], residual=attn2, eps=eps)
    else:
        qkv = fused_linear(x2, wqkv, bqkv, eps=eps)
        attn3, probs = attention_block(qkv.reshape(B, S, -1), mask, p["wo"], p["bo"],
                                       x, n_head=n_head, d_head=d_head)
        attn2 = attn3.reshape(M, H)             # MHA(x) + x (pre-LN1)
        # h = relu(LN1(attn) @ W1 + b1)
        h = fused_linear(attn2, f["w1"], f["b1"], ln_in=ln1, activation="relu", eps=eps)
        # out = LN2(h @ W2 + b2 + LN1(attn))    (LN1 recomputed on the residual: cheap VPU
        # work hidden under the MXU; avoids a standalone LN HBM round-trip)
        out2 = fused_linear(h, f["w2"], f["b2"], residual=attn2, ln_residual=ln1,
                            ln_out=ln2, eps=eps)

    return out2.reshape(B, S, H), probs


# ---------------------------------------------------------------------------
# Pure-JAX reference (same math) + deterministic params
# ---------------------------------------------------------------------------
def init_params(key, hidden, inner, n_head, d_head):
    ks = jax.random.split(key, 12)
    dqkv = n_head * d_head

    def w(k, fi, fo):
        return jax.random.normal(k, (fi, fo), jnp.float32) / math.sqrt(fi)

    def b(k, n):
        return 0.1 * jax.random.normal(k, (n,), jnp.float32)

    return {
        "ln1_g": jnp.ones((hidden,), jnp.float32),
        "ln1_b": jnp.zeros((hidden,), jnp.float32),
        "ln2_g": jnp.ones((hidden,), jnp.float32),
        "ln2_b": jnp.zeros((hidden,), jnp.float32),
        "mha": {
            "wq": w(ks[0], hidden, dqkv), "bq": b(ks[1], dqkv),
            "wk": w(ks[2], hidden, dqkv), "bk": b(ks[3], dqkv),
            "wv": w(ks[4], hidden, dqkv), "bv": b(ks[5], dqkv),
            "wo": w(ks[6], dqkv, hidden), "bo": b(ks[7], hidden),
        },
        "ffn": {
            "w1": w(ks[8], hidden, inner), "b1": b(ks[9], inner),
            "w2": w(ks[10], inner, hidden), "b2": b(ks[11], hidden),
        },
    }


def reference_forward(x, mask, params, n_head, d_head, pre_ln):
    def ln(t, g, b):
        mu = jnp.mean(t, axis=-1, keepdims=True)
        var = jnp.mean((t - mu) ** 2, axis=-1, keepdims=True)
        return (t - mu) / jnp.sqrt(var + 1e-5) * g + b

    def lin(t, w, b):
        return t @ w + b

    def mha(qx, kx, vx):
        B, S, H = qx.shape
        p = params["mha"]
        q = lin(qx, p["wq"], p["bq"]).reshape(B, S, n_head, d_head).transpose(0, 2, 1, 3)
        k = lin(kx, p["wk"], p["bk"]).reshape(B, S, n_head, d_head).transpose(0, 2, 1, 3)
        v = lin(vx, p["wv"], p["bv"]).reshape(B, S, n_head, d_head).transpose(0, 2, 1, 3)
        s = jnp.einsum("bhqd,bhkd->bhqk", q, k) / (d_head ** 0.5)
        if mask is not None:
            s = s + mask
        pr = jax.nn.softmax(s, axis=-1)
        ctx = jnp.einsum("bhqk,bhkd->bhqd", pr, v).transpose(0, 2, 1, 3).reshape(B, S, -1)
        return lin(ctx, p["wo"], p["bo"]), pr

    def ffn(t):
        f = params["ffn"]
        return lin(jax.nn.relu(lin(t, f["w1"], f["b1"])), f["w2"], f["b2"])

    if pre_ln:
        res = x
        h = ln(x, params["ln1_g"], params["ln1_b"])
        a, pr = mha(h, h, h)
        a = a + res
        o = ffn(ln(a, params["ln2_g"], params["ln2_b"])) + a
        return o, pr
    else:
        a, pr = mha(x, x, x)
        a = ln(a + x, params["ln1_g"], params["ln1_b"])
        o = ln(ffn(a) + a, params["ln2_g"], params["ln2_b"])
        return o, pr


# ---------------------------------------------------------------------------
if __name__ == "__main__":
    B, S, H = 2, 8, 32          # batch, seq_len, hidden_size (d_model)
    INNER = 64                  # FFN inner size
    N_HEAD, D_HEAD = 4, 8       # num_attention_heads, head_size

    key = jax.random.PRNGKey(0)
    kx, kp, km = jax.random.split(key, 3)
    x = jax.random.normal(kx, (B, S, H), jnp.float32)
    params = init_params(kp, H, INNER, N_HEAD, D_HEAD)

    # Additive attention mask (0 = attend, -1e9 = masked); keep diagonal attendable.
    keep = jax.random.bernoulli(km, 0.9, (B, 1, S, S))
    mask = jnp.where(keep, 0.0, -1e9).astype(jnp.float32)
    eye = jnp.eye(S, dtype=bool)[None, None]
    mask = jnp.where(eye, 0.0, mask)

    for pre_ln in (True, False):
        for m in (mask, None):
            out, attn = transformer_encoder_layer(x, m, params,
                                                  n_head=N_HEAD, d_head=D_HEAD,
                                                  pre_ln=pre_ln)
            out = jax.block_until_ready(out)
            attn = jax.block_until_ready(attn)

            ref_out, ref_attn = reference_forward(x, m, params, N_HEAD, D_HEAD, pre_ln)
            assert out.shape == (B, S, H)
            assert attn.shape == (B, N_HEAD, S, S)
            # Tolerances account for the EUP approximate reciprocal in the softmax.
            assert jnp.allclose(attn, ref_attn, atol=2e-3, rtol=2e-3), \
                f"attn-probs mismatch (pre_ln={pre_ln}, mask={'yes' if m is not None else 'none'})"
            assert jnp.allclose(out, ref_out, atol=1e-2, rtol=1e-2), \
                f"output mismatch (pre_ln={pre_ln}, mask={'yes' if m is not None else 'none'})"

    print("KERNEL_OK")
</pallas_src>

<mosaic_0001>
module attributes {stable_mosaic.version = 11 : i64} {
  func.func @kernel(%arg0: i32, %arg1: i32, %arg2: memref<8x32xf32, #tpu.memory_space<vmem>>, %arg3: memref<1x32xf32, #tpu.memory_space<vmem>>, %arg4: memref<1x32xf32, #tpu.memory_space<vmem>>, %arg5: memref<32x96xf32, #tpu.memory_space<vmem>>, %arg6: memref<1x96xf32, #tpu.memory_space<vmem>>, %arg7: memref<8x96xf32, #tpu.memory_space<vmem>>) attributes {dimension_semantics = [#tpu.dimension_semantics<parallel>, #tpu.dimension_semantics<parallel>], iteration_bounds = array<i64: 1, 2>, scalar_prefetch = 0 : i64, scratch_operands = 0 : i64, tpu.core_type = #tpu.core_type<tc>, window_params = [{transform_indices = @transform_0, window_bounds = array<i64: 8, 32>}, {pipeline_mode = #tpu.pipeline_mode<synchronous>, transform_indices = @transform_1, window_bounds = array<i64: 1, 32>}, {pipeline_mode = #tpu.pipeline_mode<synchronous>, transform_indices = @transform_2, window_bounds = array<i64: 1, 32>}, {transform_indices = @transform_3, window_bounds = array<i64: 32, 96>}, {transform_indices = @transform_4, window_bounds = array<i64: 1, 96>}, {transform_indices = @transform_5, window_bounds = array<i64: 8, 96>}]} {
    %c0 = arith.constant 0 : index
    %c0_0 = arith.constant 0 : index
    %0 = vector.load %arg2[%c0, %c0_0] : memref<8x32xf32, #tpu.memory_space<vmem>>, vector<8x32xf32>
    %c0_1 = arith.constant 0 : index
    %c0_2 = arith.constant 0 : index
    %1 = vector.load %arg3[%c0_1, %c0_2] : memref<1x32xf32, #tpu.memory_space<vmem>>, vector<1x32xf32>
    %c0_3 = arith.constant 0 : index
    %c0_4 = arith.constant 0 : index
    %2 = vector.load %arg4[%c0_3, %c0_4] : memref<1x32xf32, #tpu.memory_space<vmem>>, vector<1x32xf32>
    %cst = arith.constant dense<0.000000e+00> : vector<8xf32>
    %3 = vector.multi_reduction <add>, %0, %cst [1] : vector<8x32xf32> to vector<8xf32>
    %4 = vector.shape_cast %3 : vector<8xf32> to vector<8x1xf32>
    %cst_5 = arith.constant 3.200000e+01 : f32
    %5 = vector.broadcast %cst_5 : f32 to vector<8x1xf32>
    %6 = arith.divf %4, %5 : vector<8x1xf32>
    %7 = vector.broadcast %6 : vector<8x1xf32> to vector<8x32xf32>
    %8 = arith.subf %0, %7 : vector<8x32xf32>
    %9 = arith.mulf %8, %8 : vector<8x32xf32>
    %cst_6 = arith.constant dense<0.000000e+00> : vector<8xf32>
    %10 = vector.multi_reduction <add>, %9, %cst_6 [1] : vector<8x32xf32> to vector<8xf32>
    %11 = vector.shape_cast %10 : vector<8xf32> to vector<8x1xf32>
    %cst_7 = arith.constant 3.200000e+01 : f32
    %12 = vector.broadcast %cst_7 : f32 to vector<8x1xf32>
    %13 = arith.divf %11, %12 : vector<8x1xf32>
    %cst_8 = arith.constant 9.99999974E-6 : f32
    %14 = vector.broadcast %cst_8 : f32 to vector<8x1xf32>
    %15 = arith.addf %13, %14 : vector<8x1xf32>
    %16 = math.rsqrt %15 : vector<8x1xf32>
    %17 = vector.broadcast %16 : vector<8x1xf32> to vector<8x32xf32>
    %18 = arith.mulf %8, %17 : vector<8x32xf32>
    %19 = vector.broadcast %1 : vector<1x32xf32> to vector<8x32xf32>
    %20 = arith.mulf %18, %19 : vector<8x32xf32>
    %21 = vector.broadcast %2 : vector<1x32xf32> to vector<8x32xf32>
    %22 = arith.addf %20, %21 : vector<8x32xf32>
    %c0_9 = arith.constant 0 : index
    %c0_10 = arith.constant 0 : index
    %23 = vector.load %arg5[%c0_9, %c0_10] : memref<32x96xf32, #tpu.memory_space<vmem>>, vector<32x96xf32>
    %cst_11 = arith.constant dense<0.000000e+00> : vector<8x96xf32>
    %24 = tpu.matmul %22, %23, %cst_11 {dimension_numbers = #tpu.dot_dimension_numbers<[1], [0], [0], [1], [0, 0, 1, 1], [], []>} : vector<8x32xf32>, vector<32x96xf32>, vector<8x96xf32> -> vector<8x96xf32>
    %c0_12 = arith.constant 0 : index
    %c0_13 = arith.constant 0 : index
    %25 = vector.load %arg6[%c0_12, %c0_13] : memref<1x96xf32, #tpu.memory_space<vmem>>, vector<1x96xf32>
    %26 = vector.broadcast %25 : vector<1x96xf32> to vector<8x96xf32>
    %27 = arith.addf %24, %26 : vector<8x96xf32>
    %c0_14 = arith.constant 0 : index
    %c0_15 = arith.constant 0 : index
    %28 = vector.load %arg7[%c0_14, %c0_15] : memref<8x96xf32, #tpu.memory_space<vmem>>, vector<8x96xf32>
    tpu.vector_store %arg7[%c0_14, %c0_15], %27 {strides = array<i32>} : memref<8x96xf32, #tpu.memory_space<vmem>>, vector<8x96xf32>,
    return
  }
  func.func @transform_0(%arg0: i32, %arg1: i32) -> (i32, i32) {
    %c0_i32 = arith.constant 0 : i32
    %c0_i32_0 = arith.constant 0 : i32
    return %arg1, %c0_i32 : i32, i32
  }
  func.func @transform_1(%arg0: i32, %arg1: i32) -> (i32, i32) {
    %c0_i32 = arith.constant 0 : i32
    %c0_i32_0 = arith.constant 0 : i32
    %c0_i32_1 = arith.constant 0 : i32
    return %c0_i32, %c0_i32_0 : i32, i32
  }
  func.func @transform_2(%arg0: i32, %arg1: i32) -> (i32, i32) {
    %c0_i32 = arith.constant 0 : i32
    %c0_i32_0 = arith.constant 0 : i32
    %c0_i32_1 = arith.constant 0 : i32
    return %c0_i32, %c0_i32_0 : i32, i32
  }
  func.func @transform_3(%arg0: i32, %arg1: i32) -> (i32, i32) {
    %c0_i32 = arith.constant 0 : i32
    %c0_i32_0 = arith.constant 0 : i32
    return %c0_i32, %arg0 : i32, i32
  }
  func.func @transform_4(%arg0: i32, %arg1: i32) -> (i32, i32) {
    %c0_i32 = arith.constant 0 : i32
    %c0_i32_0 = arith.constant 0 : i32
    return %c0_i32, %arg0 : i32, i32
  }
  func.func @transform_5(%arg0: i32, %arg1: i32) -> (i32, i32) {
    %c0_i32 = arith.constant 0 : i32
    return %arg1, %arg0 : i32, i32
  }
}

</mosaic_0001>

<bundles_post_ra>
// kernel: tpu_custom_call.1
= control target key start
LH: loop header
LB: loop body
LE: loop exit
PB: predicated region body
PF: predicated region fallthrough
CT: control target
= control target key end

     0   :  { %10 = vsyncpa [#allocation3], 0  ;;  %s995_s0 = inlined_call_operand.hbm [shape: f32[16,32], index: 0, kind: input, shape index: {}]   ;;  %s996_s1 = inlined_call_operand.hbm [shape: f32[1,32], index: 1, kind: input, shape index: {}]   ;;  %s997_s2 = inlined_call_operand.vmem [shape: f32[1,32], index: 2, kind: input, shape index: {}]   ;;  %s998_s3 = inlined_call_operand.hbm [shape: f32[32,96], index: 3, kind: input, shape index: {}]   ;;  %s999_s4 = inlined_call_operand.vmem [shape: f32[1,96], index: 4, kind: input, shape index: {}]   ;;  %s1000_s5 = inlined_call_operand.hbm [shape: f32[16,96], index: 5, kind: output, shape index: {}]  }
   0x1   :  { %12 = vsyncpa [#allocation3 + $0x1], 0 }
   0x2   :  { %13 = vsyncpa [#allocation6], 0 }
   0x3   :  { %14 = vsyncpa [#allocation4], 0 }
   0x4   :  { %16 = vsyncpa [#allocation4 + $0x1], 0  ;;  %s836_s18 = smov 0   ;;  %s838_s19 = smov 0  }
   0x5   :  { %s840_s20 = smov 0   ;;  %s842_s21 = smov 0  }
   0x6   :  { %s844_s22 = smov 0   ;;  %s846_s23 = smov 0  }
   0x7 LB: > { %s511_s24 = sadd.s32 4294967295, %s799_s23   ;;  %s512_s25 = sadd.s32 4294967294, %s799_s23   ;;  %s799_s23 = sphi %s846_s23, %s22_s23   ;;  %s795_s22 = sphi %s844_s22, %s1010_s22   ;;  %s791_s21 = sphi %s842_s21, %s1009_s21   ;;  %s787_s20 = sphi %s840_s20, %s1008_s20   ;;  %s783_s19 = sphi %s838_s19, %s1007_s19   ;;  %s779_s18 = sphi %s836_s18, %s1006_s18  }
   0x8   : > { %p54_p0 = scmp.ne.s32.totalorder %s783_s19, %s779_s18  ;;  %p872_p1 = scmp.eq.s32.totalorder %s511_s24, 0 }
   0x9   : > { %p180_p2 = scmp.eq.s32.totalorder %s512_s25, 1  ;;  %p513_p4 = scmp.ge.s32.totalorder %s799_s23, 1 }
   0xa   : > { %p878_p3 = por %p872_p1, %p54_p0  ;;  %p187_p6 = scmp.lt.s32.totalorder %s799_s23, 3 }
   0xb   : > { %p883_p5 = por %p180_p2, %p54_p0  ;;  %s199_s6 = sshll.u32 %s996_s1, 4  ;;  %s200_s6 = int_to_ptr.hbm [resolvable:$true] %s199_s6 }
   0xc   : > { %p891_p7 = pnand %p513_p4, %p187_p6  ;;  %p517_p8 = scmp.ge.s32.totalorder %s799_s23, 2 }
   0xd   : > { %s801_s8 = smov [#allocation5]   ;;  %s215_s12 = sshll.u32 %s998_s3, 4  ;;  %s216_s12 = int_to_ptr.hbm [resolvable:$true] %s215_s12 }
   0xe   : > { %p542_p9 = pneg %p891_p7  ;;  %s201_s9 = sshll.u32 %s801_s8, 4  ;;  %s202_s9 = int_to_ptr.vmem [resolvable:$true] %s201_s9 }
   0xf   : > { %s802_s13 = smov [#allocation7]   ;;  %s803_s15 = smov 128  }
  0x10   : > { %p543_p10 = pnand %p542_p9, %p872_p1  ;;  %s217_s14 = sshll.u32 %s802_s13, 4  ;;  %s218_s14 = int_to_ptr.vmem [resolvable:$true] %s217_s14 }
  0x11   : > { %s804_s16 = smov 8   ;;  %p174_p11 = scmp.eq.s32.totalorder %s511_s24, 1 }
  0x12   : > { %545 = dma.hbm_to_vmem [thread:$0]  (!%p543_p10), %s200_s6, 16, %s202_s9, [#allocation6]  }
  0x13   : > { %548 = dma.hbm_to_vmem [thread:$0]  (!%p543_p10), %s216_s12, 512, %s218_s14, [#allocation6], %s803_s15, %s803_s15, %s804_s16  }
  0x14   : > { %s31_s17 = sadd.s32 1, %s795_s22  ;;  %s41_s25 = sadd.s32 1, %s787_s20 }
  0x15   : > { %p32_p12 = scmp.ge.s32.totalorder %s31_s17, 2  ;;  %p48_p13 = scmp.ne.s32.totalorder %s787_s20, %s783_s19 }
  0x16   : > { %p49_p0 = scmp.eq.s32.totalorder %s799_s23, 0  ;;  %p559_p4 = scmp.lt.s32.totalorder %s799_s23, 2 }
  0x17   : > { %s1012_s17 = smov (%p32_p12, %s31_s17), 0  ;;  %p912_p2 = por %p174_p11, %p48_p13 }
  0x18   : > { %s38_s30 = ssub.s32 %s795_s22, %s1012_s17  ;;  %s237_s6 = sand.u32 1, %s787_s20  }
  0x19   : > { %p39_p6 = scmp.eq.s32.totalorder %s38_s30, 0  ;;  %p50_p9 = por %p49_p0, %p48_p13 }
  0x1a   : > { %s518_s8 = sshll.u32 %s237_s6, 3  ;;  %s519_s24 = sshll.u32 %s795_s22, 3 }
  0x1b   : > { %s922_s9 = scalar_select %p39_p6, %s787_s20, %s41_s25  }
  0x1c   : > { %s245_s12 = scalar_lea.hbm %s995_s0, %s519_s24  ;;  %s241_s14 = scalar_lea.vmem [#allocation2], %s518_s8 }
  0x1d   : > { %s247_s13 = sshll.u32 %s245_s12, 4  ;;  %s249_s15 = sshll.u32 %s241_s14, 4  ;;  %s248_s13 = int_to_ptr.hbm [resolvable:$true] %s247_s13  ;;  %s250_s15 = int_to_ptr.vmem [resolvable:$true] %s249_s15 }
  0x1e   : > { %p550_p10 = pnand %p559_p4, %p50_p9  ;;  %s238_s16 = scalar_lea.sflag [#allocation3], %s237_s6 }
  0x1f   : > { %258 = sbr.rel (%p891_p7) target bundleno = 439 (0x1b7), region = 40  ;;  %s932_s25 = sand.u32 (!%p891_p7), 1, %s783_s19  }
  0x20   : > { %552 = dma.hbm_to_vmem [thread:$0]  (!%p550_p10), %s248_s13, 128, %s250_s15, %s238_s16  }
  0x21   : > { %s521_s30 = sshll.u32 (!%p891_p7), %s932_s25, 3  ;;  %s261_s24 = scalar_lea.sflag (!%p891_p7), [#allocation3], %s932_s25 }
  0x22   : > { %s264_s8 = scalar_lea.vmem (!%p891_p7), [#allocation2], %s521_s30 }
  0x24   : > { %766 = dma.done.wait (%p878_p3), %s261_s24, 128  }
  0x25   : > { %768 = vsyncadd (%p878_p3), %s261_s24, 4294967168 }
  0x26   : > { %770 = dma.done.wait (%p872_p1), [#allocation6], 528  }
  0x27   : > { %772 = vsyncadd (%p872_p1), [#allocation6], 4294966768  ;;  %vm311_vm0 = vcmask 261120   ;;  %v308_v0 = vld [vmem:[%s264_s8] sm:$0xff]  ;;  %v805_v2 = vmov 32.0   ;;  %v349_v17 = vld [vmem:[#allocation7] sm:$0xff] }
  0x28   : > { %v312_v1 = vsel %vm311_vm0, %v308_v0, 0.0  ;;  %619 = vrcp.f32 %v805_v2  ;;  %v352_v14 = vld [vmem:[#allocation7 + $0x18] sm:$0xff]  ;;  %v351_v15 = vld [vmem:[#allocation7 + $0x10] sm:$0xff]  ;;  %v350_v16 = vld [vmem:[#allocation7 + $0x8] sm:$0xff]  ;;  %s527_s7 = sshll.u32 %s791_s21, 3  ;;  %s304_s14 = scalar_lea.vmem [#allocation8], %s521_s30 }
  0x29   : > { %313 = vadd.xlane.f32.xlu0 %v312_v1  ;;  %372 = vmatpush.msra.mxu0 %v352_v14  ;;  %v616_v27 = vld [vmem:[#allocation5] ss:$0 sm:$0xff]  ;;  %v617_v30 = vld [vmem:[%s997_s2] ss:$0 sm:$0xff]  ;;  %s394_s11 = scalar_lea.hbm %s1000_s5, %s527_s7  ;;  %s396_s15 = sshll.u32 %s304_s14, 4  ;;  %vm380_vm5 = vcmask 785408   ;;  %s397_s15 = int_to_ptr.vmem [resolvable:$true] %s396_s15 }
  0x2a   : > { %v618_v33 = vld [vmem:[%s999_s4] ss:$0 sm:$0xff]  ;;  %s398_s16 = sshll.u32 %s394_s11, 4  ;;  %s383_s21 = scalar_lea.sflag [#allocation4], %s932_s25  ;;  %s399_s16 = int_to_ptr.hbm [resolvable:$true] %s398_s16 }
  0x2b   : > { %373 = vmatpush.msra.mxu0 %v351_v15  ;;  %s727_s24 = sshra.s32 %s399_s16, 4  ;;  %s733_s30 = scalar_lea.hbm %s1000_s5, 16  ;;  %s728_s24 = int_to_ptr.hbm [resolvable:$true] %s727_s24 }
  0x2c   : > { %s729_s8 = scalar_lea.hbm %s728_s24, 8  ;;  %p734_p11 = scmp.lt.s32.totalorder %s728_s24, %s1000_s5 }
  0x2d   : > { %374 = vmatpush.msra.mxu0 %v350_v16  ;;  %p730_p1 = scmp.ne.s32.totalorder %s728_s24, %s729_s8  ;;  %p735_p12 = scmp.lt.s32.totalorder %s733_s30, %s729_s8 }
  0x2e   : > { %v620_v3 = vpop.eup %619 }
  0x2f   : > { %v316_v4 = vmul.f32 32.0, %v620_v3  ;;  %vm320_vm1 = vweird.f32 %v620_v3  ;;  %375 = vmatpush.msra.mxu0 %v349_v17  ;;  %p731_p3 = pnand %p730_p1, %p912_p2  ;;  %p736_p13 = por %p735_p12, %p734_p11 }
  0x31   : > { %v317_v5 = vsub.f32 1.0, %v316_v4  ;;  %p732_p7 = pneg %p731_p3 }
  0x33   : > { %v318_v6 = vmul.f32 %v620_v3, %v317_v5  ;;  %p737_p0 = pnand %p736_p13, %p732_p7 }
  0x35   : > { %v319_v7 = vadd.f32 %v620_v3, %v318_v6 }
  0x37   : > { %v321_v8 = vsel %vm320_vm1, %v620_v3, %v319_v7 }
  0x9c   : > { %v314_v9 = vpop.xlane.xlu0 %313 }
  0x9d   : > { %v322_v10 = vmul.f32 %v321_v8, %v314_v9 }
  0x9f   : > { %v323_v11 = vsub.f32 %v308_v0, %v322_v10 }
  0xa1   : > { %v324_v12 = vmul.f32 %v323_v11, %v323_v11 }
  0xa3   : > { %v325_v13 = vsel %vm311_vm0, %v324_v12, 0.0 }
  0xa4   : > { %326 = vadd.xlane.f32.xlu0 %v325_v13 }
 0x117   : > { %v327_v18 = vpop.xlane.xlu0 %326 }
 0x118   : > { %v328_v19 = vmul.f32 %v327_v18, %v321_v8 }
 0x11a   : > { %v329_v20 = vadd.f32 1e-05, %v328_v19 }
 0x11c   : > { %621 = vrsqrt.f32 %v329_v20  ;;  %vm336_vm3 = vweird.f32 %v329_v20 }
 0x122   : > { %v622_v21 = vpop.eup %621 }
 0x123   : > { %v331_v22 = vmul.f32 %v622_v21, %v329_v20  ;;  %vm337_vm2 = vweird.f32 %v622_v21 }
 0x124   : > { %vm338_vm4 = vmor %vm336_vm3, %vm337_vm2 }
 0x125   : > { %v332_v23 = vmul.f32 %v622_v21, %v331_v22 }
 0x127   : > { %v333_v24 = vmul.f32 0.5, %v332_v23 }
 0x129   : > { %v334_v25 = vsub.f32 1.5, %v333_v24 }
 0x12b   : > { %v335_v26 = vmul.f32 %v622_v21, %v334_v25 }
 0x12d   : > { %v339_v28 = vsel %vm338_vm4, %v622_v21, %v335_v26 }
 0x12e   : > { %v340_v29 = vmul.f32 %v339_v28, %v323_v11 }
 0x130   : > { %v344_v31 = vmul.f32 %v616_v27, %v340_v29 }
 0x132   : > { %v348_v32 = vadd.f32 %v617_v30, %v344_v31 }
 0x134   : > { %525 = vmatmul.msk.f32.vlgmr.msra.gmra.mxu0 %vm311_vm0, %v348_v32 }
 0x1b1   : > { %v377_v34 = vpop.f32.mrf.mxu0 }
 0x1b2   : > { %v378_v35 = vadd.f32 %v618_v33, %v377_v34 }
 0x1b4   : > { %381 = vst.msk [vmem:[%s304_s14] sm:$0xff] %vm380_vm5, %v378_v35 }
 0x1b5   : > { %740 = shalt.err (!%p737_p0)
}
 0x1b6   : > { %540 = dma.vmem_to_hbm [thread:$0]  (%p912_p2), %s397_s15, 128, %s399_s16, %s383_s21  }
 0x1b7 PF: > { %s410_s25 = sand.u32 1, %s779_s18   ;;  %p554_p4 = pnand %p517_p8, %p883_p5 }
 0x1b8   : > { %s411_s10 = scalar_lea.sflag [#allocation4], %s410_s25 }
 0x1b9   : > { %p555_p6 = pneg %p554_p4 }
 0x1bb   : > { %774 = dma.done.wait (%p555_p6), %s411_s10, 128  }
 0x1bc   : > { %776 = vsyncadd (%p555_p6), %s411_s10, 4294967168  ;;  %s22_s23 = sadd.s32 1, %s799_s23   ;;  %s1006_s18 = smov %s783_s19 }
 0x1bd   : > { %p19_p9 = scmp.ge.s32.totalorder %s22_s23, 4   ;;  %s1007_s19 = smov %s787_s20 }
 0x1be   : > { %s1008_s20 = smov %s922_s9  ;;  %s1009_s21 = smov %s795_s22 }
 0x1bf   : > { %s1010_s22 = smov %s1012_s17  ;;  %21 = sbr.rel (!%p19_p9) target bundleno = 7 (0x7), region = 97 }
 0x1c4   :  { %417 = vsyncpa [#allocation3], 1 }
 0x1c5   :  { %419 = vsyncpa [#allocation3 + $0x1], 1 }
 0x1c6   :  { %420 = vsyncpa [#allocation6], 1 }
 0x1c7   :  { %421 = vsyncpa [#allocation4], 1 }
 0x1c8   :  { %423 = vsyncpa [#allocation4 + $0x1], 1 }

</bundles_post_ra>
